<compile_context>
chip_gen: v6e
topology: v6e:2x2x1
jax: 0.10.0
libtpu: 0.0.40
codegen_flags: <defaults>
</compile_context>

<pallas_src>
import functools

import jax
import jax.numpy as jnp
from jax import lax
from jax.experimental import pallas as pl
from jax.experimental.pallas import tpu as pltpu


# Request 32 MiB of scoped VMEM (== v6e default, == v7x default and well under its
# 64 MiB physical, fine on v5e's 128 MiB physical) and size tiles so the
# double-buffered working set stays under ~24 MiB.
_VMEM_LIMIT_BYTES = 32 * 1024 * 1024
_TILE_BUDGET_BYTES = 24 * 1024 * 1024
# Whole-problem-resident fused fast path threshold.
_SMALL_FUSED_LIMIT_BYTES = 6 * 1024 * 1024


def _itemsize(dt):
    return jnp.dtype(dt).itemsize


def _pick_tile(dim, preferred, bases):
    """Largest tile <= `preferred` that divides `dim` and is a multiple of one of
    `bases` (tried in order); falls back to the full dimension (always a legal
    block size, may be large for awkward/prime dims)."""
    if dim <= preferred:
        return dim
    for base in bases:
        t = (preferred // base) * base
        while t >= base:
            if dim % t == 0:
                return t
            t -= base
    return dim


# ----------------------------------------------------------------------------- #
# Elementwise binarization pass: tanh((a - thr) * hardness) -> op dtype
# ----------------------------------------------------------------------------- #
def _binarize_kernel(a_ref, thr_ref, o_ref, *, hardness):
    z = a_ref[...] - thr_ref[...]
    if hardness != 1.0:          # static Python guard: no dead vmul for hardness == 1
        z = z * hardness
    o_ref[...] = jnp.tanh(z).astype(o_ref.dtype)


def _binarize(a, thr2d, *, hardness, out_dtype):
    """2-D tiled elementwise pass. `thr2d` is either (R, K) or broadcast (1, K)."""
    R, K = a.shape
    thr_is_bcast = thr2d.shape[0] == 1
    in_b = _itemsize(a.dtype)
    thr_b = 0 if thr_is_bcast else _itemsize(thr2d.dtype)
    out_b = _itemsize(out_dtype)

    # Column tile capped at 2048 lanes so large-K blocks never force full-K VMEM
    # residency; row tile sized so the double-buffered in+thr+out set fits budget.
    tc = _pick_tile(K, 2048, (128,))
    bytes_per_row = 2 * tc * (in_b + thr_b + out_b)
    tr_cap = max(8, _TILE_BUDGET_BYTES // max(bytes_per_row, 1))
    tr = _pick_tile(R, min(512, tr_cap), (16, 8))

    kern = functools.partial(_binarize_kernel, hardness=hardness)
    return pl.pallas_call(
        kern,
        out_shape=jax.ShapeDtypeStruct((R, K), out_dtype),
        grid_spec=pltpu.PrefetchScalarGridSpec(
            num_scalar_prefetch=0,
            grid=(R // tr, K // tc),
            in_specs=[
                pl.BlockSpec((tr, tc), lambda i, j: (i, j)),
                pl.BlockSpec(
                    (1 if thr_is_bcast else tr, tc),
                    (lambda i, j: (0, j)) if thr_is_bcast else (lambda i, j: (i, j))),
            ],
            out_specs=pl.BlockSpec((tr, tc), lambda i, j: (i, j)),
        ),
        compiler_params=pltpu.CompilerParams(
            dimension_semantics=("parallel", "parallel"),
            vmem_limit_bytes=_VMEM_LIMIT_BYTES),
    )(a, thr2d)


# ----------------------------------------------------------------------------- #
# Tiled MXU matmul: out[i, j] = sum_k xb[i, k] * wb[j, k]  (contract LAST dims)
# ----------------------------------------------------------------------------- #
def _make_matmul_kernel(*, fuse_x, use_scratch, hardness, op_dtype):
    def kernel(*refs):
        if fuse_x:
            x_ref, at_ref, wb_ref, *rest = refs
        else:
            x_ref, wb_ref, *rest = refs
        if use_scratch:
            o_ref, acc_ref = rest
        else:
            (o_ref,) = rest
            acc_ref = o_ref          # f32 output: accumulate directly into the block

        if fuse_x:
            zx = x_ref[...] - at_ref[...]
            if hardness != 1.0:
                zx = zx * hardness
            xb = jnp.tanh(zx).astype(op_dtype)   # EUP work, hidden under the MXU
        else:
            xb = x_ref[...]

        # Contract last dims of both operands -> MXU fed in natural [tn, tk] layout,
        # no weight-tile transpose.
        partial = lax.dot_general(
            xb, wb_ref[...],
            dimension_numbers=(((1,), (1,)), ((), ())),
            preferred_element_type=jnp.float32)

        k = pl.program_id(2)

        @pl.when(k == 0)
        def _init():
            acc_ref[...] = partial

        @pl.when(k != 0)
        def _accum():
            acc_ref[...] += partial

        if use_scratch:
            @pl.when(k == pl.num_programs(2) - 1)
            def _store():
                o_ref[...] = acc_ref[...].astype(o_ref.dtype)

    return kernel


def _matmul(x_or_xbin, w_bin, *, out_dtype, op_dtype, fuse_x, at2d=None, hardness=1.0):
    B, K = x_or_xbin.shape
    N, _ = w_bin.shape
    use_scratch = jnp.dtype(out_dtype) != jnp.dtype(jnp.float32)

    x_b = _itemsize(x_or_xbin.dtype)
    w_b = _itemsize(w_bin.dtype)
    out_b = _itemsize(out_dtype)

    # Tile selection: biggest candidate whose double-buffered working set fits the
    # budget.  tm/tn snap to multiples of 256 (v6e/v7x MXU) when possible, else 128
    # (v5e MXU), else fall back; K (reduction) is the innermost "arbitrary" axis.
    tm = tn = tk = None
    for pm, pn, pk in ((512, 512, 1024), (256, 256, 512), (128, 128, 256)):
        tm = _pick_tile(B, pm, (256, 128, 16, 8))
        tn = _pick_tile(N, pn, (256, 128))
        tk = _pick_tile(K, pk, (256, 128))
        footprint = (2 * (tm * tk * x_b + tn * tk * w_b + tm * tn * out_b)
                     + (2 * tk * x_b if fuse_x else 0)
                     + (tm * tn * 4 if use_scratch else 0))
        if footprint <= _TILE_BUDGET_BYTES:
            break

    # v7x megacore: if the parallel (i, j) grid is a single block, split N in two
    # (when still a legal multiple of 128) so the second TensorCore gets work.
    if (B // tm) * (N // tn) == 1 and tn >= 256 and tn % 256 == 0:
        tn //= 2

    kern = _make_matmul_kernel(fuse_x=fuse_x, use_scratch=use_scratch,
                               hardness=hardness, op_dtype=op_dtype)

    in_specs = [pl.BlockSpec((tm, tk), lambda i, j, k: (i, k))]
    inputs = [x_or_xbin]
    if fuse_x:
        in_specs.append(pl.BlockSpec((1, tk), lambda i, j, k: (0, k)))
        inputs.append(at2d)
    in_specs.append(pl.BlockSpec((tn, tk), lambda i, j, k: (j, k)))
    inputs.append(w_bin)

    return pl.pallas_call(
        kern,
        out_shape=jax.ShapeDtypeStruct((B, N), out_dtype),
        grid_spec=pltpu.PrefetchScalarGridSpec(
            num_scalar_prefetch=0,
            grid=(B // tm, N // tn, K // tk),
            in_specs=in_specs,
            out_specs=pl.BlockSpec((tm, tn), lambda i, j, k: (i, j)),
            scratch_shapes=([pltpu.VMEM((tm, tn), jnp.float32)] if use_scratch else []),
        ),
        compiler_params=pltpu.CompilerParams(
            dimension_semantics=("parallel", "parallel", "arbitrary"),
            vmem_limit_bytes=_VMEM_LIMIT_BYTES),
    )(*inputs)


# ----------------------------------------------------------------------------- #
# Small-problem fully fused kernel (everything resident in VMEM, single launch)
# ----------------------------------------------------------------------------- #
def _fused_small_kernel(x_ref, at_ref, w_ref, wt_ref, o_ref, *, hardness, op_dtype):
    zx = x_ref[...] - at_ref[...]
    zw = w_ref[...] - wt_ref[...]
    if hardness != 1.0:
        zx = zx * hardness
        zw = zw * hardness
    xb = jnp.tanh(zx).astype(op_dtype)
    wb = jnp.tanh(zw).astype(op_dtype)
    o_ref[...] = lax.dot_general(
        xb, wb, dimension_numbers=(((1,), (1,)), ((), ())),
        preferred_element_type=jnp.float32).astype(o_ref.dtype)


# ----------------------------------------------------------------------------- #
# Public entry point
# ----------------------------------------------------------------------------- #
def binary_decorator_soft_forward(x, weight, weight_threshold, activation_threshold,
                                  *, hardness=1.0, use_bf16_matmul=True):
    """Training-path forward of BinaryDecoratorSoft with layer = nn.Linear (no bias):
         out = tanh((x - at) * h) @ tanh((weight - wt) * h).T
       x: [B, K]; weight / weight_threshold: [N, K]; activation_threshold: [K]."""
    B, K = x.shape
    N, K2 = weight.shape
    assert K == K2 and weight_threshold.shape == weight.shape
    assert activation_threshold.shape == (K,)

    op_dtype = jnp.bfloat16 if use_bf16_matmul else jnp.float32
    out_dtype = x.dtype
    at2d = activation_threshold.reshape(1, K)

    # --- Small-problem fast path: one fused kernel, whole problem resident in VMEM.
    resident_bytes = (_itemsize(x.dtype) * (B * K + K)
                      + _itemsize(weight.dtype) * 2 * N * K
                      + _itemsize(op_dtype) * (B * K + N * K)
                      + _itemsize(out_dtype) * B * N)
    if resident_bytes <= _SMALL_FUSED_LIMIT_BYTES:
        kern = functools.partial(_fused_small_kernel,
                                 hardness=hardness, op_dtype=op_dtype)
        return pl.pallas_call(
            kern,
            out_shape=jax.ShapeDtypeStruct((B, N), out_dtype),
            grid_spec=pltpu.PrefetchScalarGridSpec(
                num_scalar_prefetch=0,
                grid=(1,),
                in_specs=[
                    pl.BlockSpec((B, K), lambda i: (0, 0)),
                    pl.BlockSpec((1, K), lambda i: (0, 0)),
                    pl.BlockSpec((N, K), lambda i: (0, 0)),
                    pl.BlockSpec((N, K), lambda i: (0, 0)),
                ],
                out_specs=pl.BlockSpec((B, N), lambda i: (0, 0)),
            ),
            compiler_params=pltpu.CompilerParams(
                vmem_limit_bytes=_VMEM_LIMIT_BYTES),
        )(x, at2d, weight, weight_threshold)

    # --- General path: weights binarized exactly once; x-side tanh fused into the
    # matmul when the weight-tile reuse of x is low (<= 2 N-tiles), otherwise a
    # separate single-pass x binarization.
    w_bin = _binarize(weight, weight_threshold, hardness=hardness, out_dtype=op_dtype)

    tn_probe = _pick_tile(N, 512, (256, 128))
    n_tiles = -(-N // tn_probe)
    if n_tiles <= 2:
        return _matmul(x, w_bin, out_dtype=out_dtype, op_dtype=op_dtype,
                       fuse_x=True, at2d=at2d, hardness=hardness)

    x_bin = _binarize(x, at2d, hardness=hardness, out_dtype=op_dtype)
    return _matmul(x_bin, w_bin, out_dtype=out_dtype, op_dtype=op_dtype, fuse_x=False)


if __name__ == "__main__":
    # ---- Test 1: small shapes consistent with Linear(in_features=128, out_features=128)
    # (takes the single fused-kernel fast path).
    B, IN, OUT = 8, 128, 128
    key = jax.random.PRNGKey(0)
    kx, kw, kwt, kat = jax.random.split(key, 4)

    x = jax.random.normal(kx, (B, IN), dtype=jnp.float32)
    weight = jax.random.normal(kw, (OUT, IN), dtype=jnp.float32)             # layer.weight
    weight_threshold = jax.random.normal(kwt, (OUT, IN), dtype=jnp.float32)  # Parameter(randn(weight.shape))
    activation_threshold = jax.random.normal(kat, (IN,), dtype=jnp.float32)  # Parameter(randn(in_features))

    out = binary_decorator_soft_forward(x, weight, weight_threshold, activation_threshold)
    out = jax.block_until_ready(out)
    assert out.shape == (B, OUT)

    xb = jnp.tanh(x - activation_threshold[None, :])
    wb = jnp.tanh(weight - weight_threshold)
    ref_bf16 = lax.dot_general(
        xb.astype(jnp.bfloat16), wb.astype(jnp.bfloat16),
        dimension_numbers=(((1,), (1,)), ((), ())),
        preferred_element_type=jnp.float32)
    assert jnp.allclose(out, ref_bf16, atol=3e-2, rtol=1e-2), "mismatch vs bf16-cast reference"
    ref_f32 = xb @ wb.T
    assert jnp.allclose(out, ref_f32, atol=0.15, rtol=0.05), "mismatch vs f32 reference"

    # ---- Test 2: larger shapes to exercise the general tiled path
    # (2-D tiled binarize passes + tiled MXU matmul with direct-f32 accumulation).
    B2, IN2, OUT2 = 256, 1024, 1536
    k2x, k2w, k2wt, k2at = jax.random.split(jax.random.PRNGKey(1), 4)
    x2 = jax.random.normal(k2x, (B2, IN2), dtype=jnp.float32)
    w2 = jax.random.normal(k2w, (OUT2, IN2), dtype=jnp.float32)
    wt2 = jax.random.normal(k2wt, (OUT2, IN2), dtype=jnp.float32)
    at2 = jax.random.normal(k2at, (IN2,), dtype=jnp.float32)

    out2 = binary_decorator_soft_forward(x2, w2, wt2, at2)
    out2 = jax.block_until_ready(out2)
    assert out2.shape == (B2, OUT2)

    ref2 = jnp.tanh(x2 - at2[None, :]) @ jnp.tanh(w2 - wt2).T
    rel_err = jnp.max(jnp.abs(out2 - ref2)) / jnp.max(jnp.abs(ref2))
    assert rel_err < 2e-2, f"tiled-path mismatch vs f32 reference (rel max err {rel_err})"

    print("KERNEL_OK")
</pallas_src>

<mosaic_0001>
module attributes {stable_mosaic.version = 11 : i64} {
  func.func @_fused_small_kernel(%arg0: i32, %arg1: memref<8x128xf32, #tpu.memory_space<vmem>>, %arg2: memref<1x128xf32, #tpu.memory_space<vmem>>, %arg3: memref<128x128xf32, #tpu.memory_space<vmem>>, %arg4: memref<128x128xf32, #tpu.memory_space<vmem>>, %arg5: memref<8x128xf32, #tpu.memory_space<vmem>>) attributes {dimension_semantics = [#tpu.dimension_semantics<arbitrary>], iteration_bounds = array<i64: 1>, scalar_prefetch = 0 : i64, scratch_operands = 0 : i64, tpu.core_type = #tpu.core_type<tc>, window_params = [{pipeline_mode = #tpu.pipeline_mode<synchronous>, transform_indices = @transform_0, window_bounds = array<i64: 8, 128>}, {pipeline_mode = #tpu.pipeline_mode<synchronous>, transform_indices = @transform_1, window_bounds = array<i64: 1, 128>}, {pipeline_mode = #tpu.pipeline_mode<synchronous>, transform_indices = @transform_2, window_bounds = array<i64: 128, 128>}, {pipeline_mode = #tpu.pipeline_mode<synchronous>, transform_indices = @transform_3, window_bounds = array<i64: 128, 128>}, {pipeline_mode = #tpu.pipeline_mode<synchronous>, transform_indices = @transform_4, window_bounds = array<i64: 8, 128>}]} {
    %c0 = arith.constant 0 : index
    %c0_0 = arith.constant 0 : index
    %0 = vector.load %arg1[%c0, %c0_0] : memref<8x128xf32, #tpu.memory_space<vmem>>, vector<8x128xf32>
    %c0_1 = arith.constant 0 : index
    %c0_2 = arith.constant 0 : index
    %1 = vector.load %arg2[%c0_1, %c0_2] : memref<1x128xf32, #tpu.memory_space<vmem>>, vector<1x128xf32>
    %2 = vector.broadcast %1 : vector<1x128xf32> to vector<8x128xf32>
    %3 = arith.subf %0, %2 : vector<8x128xf32>
    %c0_3 = arith.constant 0 : index
    %c0_4 = arith.constant 0 : index
    %4 = vector.load %arg3[%c0_3, %c0_4] : memref<128x128xf32, #tpu.memory_space<vmem>>, vector<128x128xf32>
    %c0_5 = arith.constant 0 : index
    %c0_6 = arith.constant 0 : index
    %5 = vector.load %arg4[%c0_5, %c0_6] : memref<128x128xf32, #tpu.memory_space<vmem>>, vector<128x128xf32>
    %6 = arith.subf %4, %5 : vector<128x128xf32>
    %7 = math.tanh %3 : vector<8x128xf32>
    %8 = arith.truncf %7 : vector<8x128xf32> to vector<8x128xbf16>
    %9 = math.tanh %6 : vector<128x128xf32>
    %10 = arith.truncf %9 : vector<128x128xf32> to vector<128x128xbf16>
    %cst = arith.constant dense<0.000000e+00> : vector<8x128xf32>
    %11 = tpu.matmul %8, %10, %cst {dimension_numbers = #tpu.dot_dimension_numbers<[1], [1], [0], [0], [0, 0, 1, 0], [], []>} : vector<8x128xbf16>, vector<128x128xbf16>, vector<8x128xf32> -> vector<8x128xf32>
    %c0_7 = arith.constant 0 : index
    %c0_8 = arith.constant 0 : index
    %12 = vector.load %arg5[%c0_7, %c0_8] : memref<8x128xf32, #tpu.memory_space<vmem>>, vector<8x128xf32>
    tpu.vector_store %arg5[%c0_7, %c0_8], %11 {strides = array<i32>} : memref<8x128xf32, #tpu.memory_space<vmem>>, vector<8x128xf32>,
    return
  }
  func.func @transform_0(%arg0: i32) -> (i32, i32) {
    %c0_i32 = arith.constant 0 : i32
    %c0_i32_0 = arith.constant 0 : i32
    %c0_i32_1 = arith.constant 0 : i32
    return %c0_i32, %c0_i32_0 : i32, i32
  }
  func.func @transform_1(%arg0: i32) -> (i32, i32) {
    %c0_i32 = arith.constant 0 : i32
    %c0_i32_0 = arith.constant 0 : i32
    %c0_i32_1 = arith.constant 0 : i32
    return %c0_i32, %c0_i32_0 : i32, i32
  }
  func.func @transform_2(%arg0: i32) -> (i32, i32) {
    %c0_i32 = arith.constant 0 : i32
    %c0_i32_0 = arith.constant 0 : i32
    %c0_i32_1 = arith.constant 0 : i32
    return %c0_i32, %c0_i32_0 : i32, i32
  }
  func.func @transform_3(%arg0: i32) -> (i32, i32) {
    %c0_i32 = arith.constant 0 : i32
    %c0_i32_0 = arith.constant 0 : i32
    %c0_i32_1 = arith.constant 0 : i32
    return %c0_i32, %c0_i32_0 : i32, i32
  }
  func.func @transform_4(%arg0: i32) -> (i32, i32) {
    %c0_i32 = arith.constant 0 : i32
    %c0_i32_0 = arith.constant 0 : i32
    %c0_i32_1 = arith.constant 0 : i32
    return %c0_i32, %c0_i32_0 : i32, i32
  }
}

</mosaic_0001>

<bundles_post_ra>
// kernel: tpu_custom_call.1
= control target key start
LH: loop header
LB: loop body
LE: loop exit
PB: predicated region body
PF: predicated region fallthrough
CT: control target
= control target key end

     0   :  { %9 = vsyncpa [#allocation3], 0  ;;  %s413_s0 = inlined_call_operand.hbm [shape: f32[8,128], index: 0, kind: input, shape index: {}]   ;;  %s414_s1 = inlined_call_operand.vmem [shape: f32[1,128], index: 1, kind: input, shape index: {}]   ;;  %s415_s2 = inlined_call_operand.hbm [shape: f32[128,128], index: 2, kind: input, shape index: {}]   ;;  %s416_s3 = inlined_call_operand.hbm [shape: f32[128,128], index: 3, kind: input, shape index: {}]   ;;  %s417_s4 = inlined_call_operand.hbm [shape: f32[8,128], index: 4, kind: output, shape index: {}]  }
   0x1   :  { %10 = vsyncpa [#allocation6], 0 }
   0x2   :  { %11 = vsyncpa [#allocation4], 0  ;;  %s356_s15 = smov [#allocation5]  }
   0x3   :  { %s29_s16 = sshll.u32 %s356_s15, 4  ;;  %s30_s16 = int_to_ptr.vmem [resolvable:$true] %s29_s16 }
   0x4   :  { %s278_s17 = scalar_lea.vmem %s30_s16, 2048  ;;  %p283_p1 = scmp.lt.s32.totalorder %s30_s16, %s30_s16 }
   0x5   :  { %p279_p0 = scmp.ne.s32.totalorder %s30_s16, %s278_s17  ;;  %p284_p2 = scmp.lt.s32.totalorder %s278_s17, %s278_s17 }
   0x7   :  { %p285_p3 = por %p284_p2, %p283_p1 }
   0x9   :  { %p286_p4 = pnand %p285_p3, %p279_p0 }
   0xb   :  { %289 = shalt.err (!%p286_p4)
}
   0xc   :  { %s357_s18 = smov 128   ;;  %s358_s19 = smov 8  }
   0xd   :  { %35 = dma.hbm_to_vmem [thread:$0]  %s415_s2, 2048, %s30_s16, [#allocation6], %s357_s18, %s357_s18, %s358_s19  }
   0xe   :  { %s359_s22 = smov [#allocation2]   ;;  %s360_s24 = smov [#allocation7]  }
   0xf   :  { %s18_s23 = sshll.u32 %s359_s22, 4  ;;  %s41_s25 = sshll.u32 %s360_s24, 4  ;;  %s19_s23 = int_to_ptr.vmem [resolvable:$true] %s18_s23  ;;  %s42_s25 = int_to_ptr.vmem [resolvable:$true] %s41_s25 }
  0x10   :  { %s298_s26 = scalar_lea.vmem %s19_s23, 128  ;;  %p303_p6 = scmp.lt.s32.totalorder %s19_s23, %s19_s23 }
  0x11   :  { %p299_p5 = scmp.ne.s32.totalorder %s19_s23, %s298_s26  ;;  %p304_p7 = scmp.lt.s32.totalorder %s298_s26, %s298_s26 }
  0x13   :  { %p305_p8 = por %p304_p7, %p303_p6 }
  0x15   :  { %p306_p9 = pnand %p305_p8, %p299_p5 }
  0x17   :  { %309 = shalt.err (!%p306_p9)
}
  0x18   :  { %21 = dma.hbm_to_vmem [thread:$0]  %s413_s0, 128, %s19_s23, [#allocation3]  }
  0x19   :  { %s318_s29 = scalar_lea.vmem %s42_s25, 2048  ;;  %p323_p11 = scmp.lt.s32.totalorder %s42_s25, %s42_s25 }
  0x1a   :  { %p319_p10 = scmp.ne.s32.totalorder %s42_s25, %s318_s29  ;;  %p324_p12 = scmp.lt.s32.totalorder %s318_s29, %s318_s29 }
  0x1c   :  { %p325_p13 = por %p324_p12, %p323_p11 }
  0x1e   :  { %p326_p0 = pnand %p325_p13, %p319_p10 }
  0x20   :  { %329 = shalt.err (!%p326_p0)
}
  0x21   :  { %47 = dma.hbm_to_vmem [thread:$0]  %s416_s3, 2048, %s42_s25, [#allocation6], %s357_s18, %s357_s18, %s358_s19  }
  0x22   :  { %350 = dma.done.wait [#allocation3], 128  }
  0x23   :  { %351 = vsyncadd [#allocation3], 4294967168 }
  0x24   :  { %352 = dma.done.wait [#allocation6], 4096  }
  0x25   :  { %353 = vsyncadd [#allocation6], 4294963200  ;;  %v361_v0 = vmov 0.0   ;;  %vm362_vm0 = vmmov 0   ;;  %v81_v1 = vld [vmem:[#allocation5 + $0x70] sm:$0xff]  ;;  %v82_v2 = vld [vmem:[#allocation5 + $0x78] sm:$0xff] }
  0x26   :  { %208 = vmatprep.subr.bf16.mxu0 %v361_v0  ;;  %224 = vmatprep.mubr.msk.bf16.mxu0 %vm362_vm0, %v361_v0  ;;  %v97_v3 = vld [vmem:[#allocation7 + $0x70] sm:$0xff]  ;;  %v98_v4 = vld [vmem:[#allocation7 + $0x78] sm:$0xff]  ;;  %v79_v6 = vld [vmem:[#allocation5 + $0x60] sm:$0xff]  ;;  %s363_s5 = smov [#allocation8]  }
  0x27   :  { %v113_v5 = vsub.f32 %v81_v1, %v97_v3  ;;  %v80_v7 = vld [vmem:[#allocation5 + $0x68] sm:$0xff]  ;;  %v114_v8 = vsub.f32 %v82_v2, %v98_v4  ;;  %v95_v9 = vld [vmem:[#allocation7 + $0x60] sm:$0xff]  ;;  %v77_v13 = vld [vmem:[#allocation5 + $0x50] sm:$0xff] }
  0x28   :  { %v96_v10 = vld [vmem:[#allocation7 + $0x68] sm:$0xff]  ;;  %v111_v11 = vsub.f32 %v79_v6, %v95_v9  ;;  %v93_v14 = vld [vmem:[#allocation7 + $0x50] sm:$0xff]  ;;  %v78_v15 = vld [vmem:[#allocation5 + $0x58] sm:$0xff] }
  0x29   :  { %236 = vtanh.f32 %v113_v5  ;;  %v112_v12 = vsub.f32 %v80_v7, %v96_v10  ;;  %v94_v16 = vld [vmem:[#allocation7 + $0x58] sm:$0xff]  ;;  %v109_v17 = vsub.f32 %v77_v13, %v93_v14  ;;  %v75_v20 = vld [vmem:[#allocation5 + $0x40] sm:$0xff]  ;;  %v76_v23 = vld [vmem:[#allocation5 + $0x48] sm:$0xff] }
  0x2a   :  { %238 = vtanh.f32 %v114_v8  ;;  %v110_v18 = vsub.f32 %v78_v15, %v94_v16  ;;  %v91_v21 = vld [vmem:[#allocation7 + $0x40] sm:$0xff]  ;;  %v92_v24 = vld [vmem:[#allocation7 + $0x48] sm:$0xff]  ;;  %v73_v31 = vld [vmem:[#allocation5 + $0x30] sm:$0xff] }
  0x2b   :  { %240 = vtanh.f32 %v111_v11  ;;  %v107_v26 = vsub.f32 %v75_v20, %v91_v21  ;;  %v108_v28 = vsub.f32 %v76_v23, %v92_v24  ;;  %v89_v32 = vld [vmem:[#allocation7 + $0x30] sm:$0xff]  ;;  %v74_v33 = vld [vmem:[#allocation5 + $0x38] sm:$0xff]  ;;  %v71_v40 = vld [vmem:[#allocation5 + $0x20] sm:$0xff] }
  0x2c   :  { %242 = vtanh.f32 %v112_v12  ;;  %v90_v34 = vld [vmem:[#allocation7 + $0x38] sm:$0xff]  ;;  %v105_v35 = vsub.f32 %v73_v31, %v89_v32  ;;  %v87_v41 = vld [vmem:[#allocation7 + $0x20] sm:$0xff]  ;;  %v72_v42 = vld [vmem:[#allocation5 + $0x28] sm:$0xff] }
  0x2d   :  { %244 = vtanh.f32 %v109_v17  ;;  %v106_v37 = vsub.f32 %v74_v33, %v90_v34  ;;  %v88_v43 = vld [vmem:[#allocation7 + $0x28] sm:$0xff]  ;;  %v103_v44 = vsub.f32 %v71_v40, %v87_v41  ;;  %v69_v49 = vld [vmem:[#allocation5 + $0x10] sm:$0xff]  ;;  %v70_v51 = vld [vmem:[#allocation5 + $0x18] sm:$0xff] }
  0x2e   :  { %246 = vtanh.f32 %v110_v18  ;;  %v104_v46 = vsub.f32 %v72_v42, %v88_v43  ;;  %v85_v50 = vld [vmem:[#allocation7 + $0x10] sm:$0xff]  ;;  %v86_v52 = vld [vmem:[#allocation7 + $0x18] sm:$0xff]  ;;  %v67_v58 = vld [vmem:[#allocation5] sm:$0xff] }
  0x2f   :  { %248 = vtanh.f32 %v107_v26  ;;  %v101_v53 = vsub.f32 %v69_v49, %v85_v50  ;;  %v102_v55 = vsub.f32 %v70_v51, %v86_v52  ;;  %v83_v59 = vld [vmem:[#allocation7] sm:$0xff]  ;;  %v68_v60 = vld [vmem:[#allocation5 + $0x8] sm:$0xff]  ;;  %v58_v4 = vld [vmem:[#allocation2] sm:$0xff] }
  0x30   :  { %250 = vtanh.f32 %v108_v28  ;;  %v84_v61 = vld [vmem:[#allocation7 + $0x8] sm:$0xff]  ;;  %v99_v62 = vsub.f32 %v67_v58, %v83_v59  ;;  %v198_v5 = vld [vmem:[%s414_s1] ss:$0 sm:$0xff]  ;;  %s188_s1 = sshll.u32 %s363_s5, 4  ;;  %s189_s1 = int_to_ptr.vmem [resolvable:$true] %s188_s1 }
  0x31   :  { %252 = vtanh.f32 %v105_v35  ;;  %v100_v1 = vsub.f32 %v68_v60, %v84_v61  ;;  %v66_v6 = vsub.f32 %v58_v4, %v198_v5  ;;  %s330_s6 = scalar_lea.vmem %s189_s1, 128  ;;  %p335_p2 = scmp.lt.s32.totalorder %s189_s1, %s189_s1 }
  0x32   :  { %254 = vtanh.f32 %v106_v37  ;;  %p331_p1 = scmp.ne.s32.totalorder %s189_s1, %s330_s6  ;;  %p336_p3 = scmp.lt.s32.totalorder %s330_s6, %s330_s6 }
  0x33   :  { %256 = vtanh.f32 %v103_v44 }
  0x34   :  { %258 = vtanh.f32 %v104_v46  ;;  %p337_p4 = por %p336_p3, %p335_p2 }
  0x35   :  { %260 = vtanh.f32 %v101_v53 }
  0x36   :  { %v237_v19 = vpop.eup %236  ;;  %262 = vtanh.f32 %v102_v55  ;;  %p338_p5 = pnand %p337_p4, %p331_p1 }
  0x37   :  { %v239_v22 = vpop.eup %238  ;;  %264 = vtanh.f32 %v99_v62 }
  0x38   :  { %v140_v25 = vpack.c.bf16 %v239_v22, %v237_v19  ;;  %v241_v27 = vpop.eup %240  ;;  %266 = vtanh.f32 %v100_v1 }
  0x39   :  { %v243_v29 = vpop.eup %242  ;;  %268 = vtanh.f32 %v66_v6 }
  0x3a   :  { %209 = vmatpush3.bf16.xpose.msra.mxu0 %v140_v25  ;;  %v139_v30 = vpack.c.bf16 %v243_v29, %v241_v27  ;;  %v245_v36 = vpop.eup %244 }
  0x3b   :  { %210 = vmatprep.subr.bf16.mxu0 %v361_v0  ;;  %v247_v38 = vpop.eup %246 }
  0x3c   :  { %v138_v39 = vpack.c.bf16 %v247_v38, %v245_v36  ;;  %v249_v45 = vpop.eup %248 }
  0x3d   :  { %v251_v47 = vpop.eup %250 }
  0x3e   :  { %v137_v48 = vpack.c.bf16 %v251_v47, %v249_v45  ;;  %v253_v54 = vpop.eup %252 }
  0x3f   :  { %v255_v56 = vpop.eup %254 }
  0x40   :  { %v136_v57 = vpack.c.bf16 %v255_v56, %v253_v54  ;;  %v257_v63 = vpop.eup %256 }
  0x41   :  { %v259_v2 = vpop.eup %258 }
  0x42   :  { %211 = vmatpush3.bf16.xpose.msra.mxu0 %v139_v30  ;;  %v135_v3 = vpack.c.bf16 %v259_v2, %v257_v63  ;;  %v261_v7 = vpop.eup %260 }
  0x43   :  { %212 = vmatprep.subr.bf16.mxu0 %v361_v0  ;;  %v263_v8 = vpop.eup %262 }
  0x44   :  { %v134_v9 = vpack.c.bf16 %v263_v8, %v261_v7  ;;  %v265_v10 = vpop.eup %264 }
  0x45   :  { %v267_v11 = vpop.eup %266 }
  0x46   :  { %v133_v12 = vpack.c.bf16 %v267_v11, %v265_v10  ;;  %v269_v13 = vpop.eup %268 }
  0x47   :  { %v116_v14 = vpack.c.bf16 %v269_v13, %v269_v13 }
  0x4a   :  { %213 = vmatpush3.bf16.xpose.msra.mxu0 %v138_v39 }
  0x4b   :  { %214 = vmatprep.subr.bf16.mxu0 %v361_v0 }
  0x52   :  { %215 = vmatpush3.bf16.xpose.msra.mxu0 %v137_v48 }
  0x53   :  { %216 = vmatprep.subr.bf16.mxu0 %v361_v0 }
  0x5a   :  { %217 = vmatpush3.bf16.xpose.msra.mxu0 %v136_v57 }
  0x5b   :  { %218 = vmatprep.subr.bf16.mxu0 %v361_v0 }
  0x62   :  { %219 = vmatpush3.bf16.xpose.msra.mxu0 %v135_v3 }
  0x63   :  { %220 = vmatprep.subr.bf16.mxu0 %v361_v0 }
  0x6a   :  { %221 = vmatpush3.bf16.xpose.msra.mxu0 %v134_v9 }
  0x6b   :  { %222 = vmatprep.subr.bf16.mxu0 %v361_v0 }
  0x72   :  { %223 = vmatpush3.bf16.xpose.msra.mxu0 %v133_v12 }
  0x79   :  { %225 = vmatmul.mubr.bf16.vlgmr.msra.gmra.mxu0 %v116_v14 }
 0x139   :  { %v175_v15 = vpop.f32.mrf.mxu0 }
 0x13a   :  { %181 = vst [vmem:[#allocation8] sm:$0xff] %v175_v15 }
 0x13b   :  { %v226_v16 = vpop.f32.mrf.mxu0 }
 0x13c   :  { %341 = shalt.err (!%p338_p5)
}
 0x13d   :  { %191 = dma.vmem_to_hbm [thread:$0]  %s189_s1, 128, %s417_s4, [#allocation4]   ;;  %v178_v0 = vpop.f32.mrf.mxu0 }
 0x13f   :  { %v227_v17 = vpop.f32.mrf.mxu0 }
 0x140   :  { %354 = dma.done.wait [#allocation4], 128  }
 0x141   :  { %355 = vsyncadd [#allocation4], 4294967168 }
 0x142   :  { %195 = vsyncpa [#allocation3], 1 }
 0x143   :  { %196 = vsyncpa [#allocation6], 1 }
 0x144   :  { %197 = vsyncpa [#allocation4], 1 }

</bundles_post_ra>
